<compile_context>
chip_gen: v5e
topology: v5e:2x2
jax: 0.10.0
libtpu: 0.0.40
codegen_flags: <defaults>
</compile_context>

<pallas_src>
import functools

import jax
import jax.numpy as jnp
from jax.experimental import pallas as pl
from jax.experimental.pallas import tpu as pltpu


# ~1.25 MiB of f32 working set per block (see header).
_TARGET_BLOCK_BYTES = 5 << 18


def _plan_row_tile(n_rows, seq_len, itemsize):
    """Rows per grid block: multiple of the dtype sublane pack, byte-targeted."""
    pack = max(8, 32 // itemsize)                       # 8 f32, 16 bf16, 32 int8/fp8
    raw = _TARGET_BLOCK_BYTES // max(1, seq_len * 4)    # accumulation happens in f32
    tile = max(pack, (raw // pack) * pack)
    if n_rows <= tile:
        return n_rows           # single block spanning the full rows dim (always legal)
    return tile


def _decomp_kernel(x_ref, trend_ref, seas_ref, *, kernel_size, pad):
    """Average-pool every row of the block along its minor (lane) axis."""
    xf = x_ref[...].astype(jnp.float32)                 # (rows, S)
    rows, s = xf.shape

    # AvgPool1d's zero padding, reproduced in VMEM (no extra HBM pass).
    if pad > 0:
        z = jnp.zeros((rows, pad), jnp.float32)
        xpad = jnp.concatenate([z, xf, z], axis=-1)      # (rows, S + 2*pad)
    else:
        xpad = xf

    # k-term sliding sum, fully unrolled (k is small & static).  Shifted terms
    # are static lane-axis slices -> XLU lane rotations, no sublane relayouts.
    acc = xpad[:, 0:s]
    for d in range(1, kernel_size):
        acc = acc + xpad[:, d:d + s]

    # count_include_pad=True: always divide by kernel_size.
    trend = acc * jnp.float32(1.0 / kernel_size)
    trend_ref[...] = trend.astype(trend_ref.dtype)
    seas_ref[...] = (xf - trend).astype(seas_ref.dtype)


@functools.partial(jax.jit, static_argnums=1)
def series_decomposition(x, kernel_size):
    """x: (batch, seq_len, n_features) -> (trend, seasonal), same shape & dtype."""
    assert kernel_size >= 1 and kernel_size % 2 == 1, (
        "odd kernel_size required (the module's reshape needs pooled len == seq_len)")
    batch, seq_len, n_features = x.shape
    pad = kernel_size // 2

    # Metadata-only reshape, same row-major linear order as torch's .reshape:
    # the pooling axis becomes the minor / lane axis.
    rows = batch * n_features
    x2 = x.reshape(rows, seq_len)

    itemsize = jnp.dtype(x.dtype).itemsize
    tile_rows = _plan_row_tile(rows, seq_len, itemsize)
    grid = (pl.cdiv(rows, tile_rows),)    # partial last tile: Pallas block padding

    kernel = functools.partial(_decomp_kernel, kernel_size=kernel_size, pad=pad)
    out_sds = jax.ShapeDtypeStruct((rows, seq_len), x.dtype)

    def idx(i):
        return (i, 0)

    trend2, seasonal2 = pl.pallas_call(
        kernel,
        out_shape=(out_sds, out_sds),
        grid=grid,
        in_specs=[pl.BlockSpec((tile_rows, seq_len), idx)],
        out_specs=(pl.BlockSpec((tile_rows, seq_len), idx),
                   pl.BlockSpec((tile_rows, seq_len), idx)),
        compiler_params=pltpu.CompilerParams(
            dimension_semantics=("parallel",),          # shard row tiles across TCs
            vmem_limit_bytes=32 * 1024 * 1024),
        cost_estimate=pl.CostEstimate(
            flops=rows * seq_len * (kernel_size + 1),
            transcendentals=0,
            bytes_accessed=3 * rows * seq_len * itemsize),
    )(x2)

    return (trend2.reshape(batch, seq_len, n_features),
            seasonal2.reshape(batch, seq_len, n_features))


def _reference(x, kernel_size):
    """Pure-JAX mirror of the PyTorch forward (reshape -> AvgPool1d -> reshape)."""
    b, s, f = x.shape
    p = kernel_size // 2
    xr = x.reshape(b * f, s).astype(jnp.float32)         # same flatten as torch .reshape
    xp = jnp.pad(xr, ((0, 0), (p, p)))                   # zero padding
    trend = sum(xp[:, d:d + s] for d in range(kernel_size)) / kernel_size
    trend = trend.reshape(b, s, f)
    seasonal = x.astype(jnp.float32) - trend
    return trend.astype(x.dtype), seasonal.astype(x.dtype)


if __name__ == "__main__":
    key = jax.random.PRNGKey(0)
    k1, k2 = jax.random.split(key)

    # Small demo shape consistent with the module: (batch, seq_len, n_features).
    batch, seq_len, n_features = 2, 16, 8
    kernel_size = 5   # SeriesDecomposition(kernel_size=5); no learnable params
    x = jax.random.normal(k1, (batch, seq_len, n_features), dtype=jnp.float32)

    trend, seasonal = series_decomposition(x, kernel_size)
    jax.block_until_ready((trend, seasonal))
    t_ref, s_ref = _reference(x, kernel_size)
    assert trend.shape == x.shape and seasonal.shape == x.shape
    assert jnp.allclose(trend, t_ref, atol=1e-5, rtol=1e-5)
    assert jnp.allclose(seasonal, s_ref, atol=1e-5, rtol=1e-5)

    # Larger shape exercising the lane-dense path, a multi-tile grid and a
    # partial last row tile (rows = 3*120 = 360, tile_rows = 320).
    x2 = jax.random.normal(k2, (3, 1024, 120), dtype=jnp.float32)
    t2, s2 = series_decomposition(x2, 25)
    jax.block_until_ready((t2, s2))
    t2_ref, s2_ref = _reference(x2, 25)
    assert jnp.allclose(t2, t2_ref, atol=1e-5, rtol=1e-5)
    assert jnp.allclose(s2, s2_ref, atol=1e-5, rtol=1e-5)

    print("KERNEL_OK")
</pallas_src>

<mosaic_0001>
module attributes {stable_mosaic.version = 11 : i64} {
  func.func @_decomp_kernel(%arg0: i32, %arg1: memref<16x16xf32, #tpu.memory_space<vmem>>, %arg2: memref<16x16xf32, #tpu.memory_space<vmem>>, %arg3: memref<16x16xf32, #tpu.memory_space<vmem>>) attributes {dimension_semantics = [#tpu.dimension_semantics<parallel>], iteration_bounds = array<i64: 1>, scalar_prefetch = 0 : i64, scratch_operands = 0 : i64, tpu.core_type = #tpu.core_type<tc>, window_params = [{transform_indices = @transform_0, window_bounds = array<i64: 16, 16>}, {transform_indices = @transform_1, window_bounds = array<i64: 16, 16>}, {transform_indices = @transform_2, window_bounds = array<i64: 16, 16>}]} {
    %c0 = arith.constant 0 : index
    %c0_0 = arith.constant 0 : index
    %0 = vector.load %arg1[%c0, %c0_0] : memref<16x16xf32, #tpu.memory_space<vmem>>, vector<16x16xf32>
    %cst = arith.constant 0.000000e+00 : f32
    %1 = vector.broadcast %cst : f32 to vector<16x2xf32>
    %2 = tpu.concatenate %1, %0, %1 in 1 : vector<16x2xf32>, vector<16x16xf32>, vector<16x2xf32> -> vector<16x20xf32>
    %3 = vector.extract_strided_slice %2 {offsets = [0, 0], sizes = [16, 16], strides = [1, 1]} : vector<16x20xf32> to vector<16x16xf32>
    %4 = vector.extract_strided_slice %2 {offsets = [0, 1], sizes = [16, 16], strides = [1, 1]} : vector<16x20xf32> to vector<16x16xf32>
    %5 = arith.addf %3, %4 : vector<16x16xf32>
    %6 = vector.extract_strided_slice %2 {offsets = [0, 2], sizes = [16, 16], strides = [1, 1]} : vector<16x20xf32> to vector<16x16xf32>
    %7 = arith.addf %5, %6 : vector<16x16xf32>
    %8 = vector.extract_strided_slice %2 {offsets = [0, 3], sizes = [16, 16], strides = [1, 1]} : vector<16x20xf32> to vector<16x16xf32>
    %9 = arith.addf %7, %8 : vector<16x16xf32>
    %10 = vector.extract_strided_slice %2 {offsets = [0, 4], sizes = [16, 16], strides = [1, 1]} : vector<16x20xf32> to vector<16x16xf32>
    %11 = arith.addf %9, %10 : vector<16x16xf32>
    %cst_1 = arith.constant 2.000000e-01 : f32
    %12 = vector.broadcast %cst_1 : f32 to vector<16x16xf32>
    %13 = arith.mulf %11, %12 : vector<16x16xf32>
    %c0_2 = arith.constant 0 : index
    %c0_3 = arith.constant 0 : index
    %14 = vector.load %arg2[%c0_2, %c0_3] : memref<16x16xf32, #tpu.memory_space<vmem>>, vector<16x16xf32>
    tpu.vector_store %arg2[%c0_2, %c0_3], %13 {strides = array<i32>} : memref<16x16xf32, #tpu.memory_space<vmem>>, vector<16x16xf32>,
    %15 = arith.subf %0, %13 : vector<16x16xf32>
    %c0_4 = arith.constant 0 : index
    %c0_5 = arith.constant 0 : index
    %16 = vector.load %arg3[%c0_4, %c0_5] : memref<16x16xf32, #tpu.memory_space<vmem>>, vector<16x16xf32>
    tpu.vector_store %arg3[%c0_4, %c0_5], %15 {strides = array<i32>} : memref<16x16xf32, #tpu.memory_space<vmem>>, vector<16x16xf32>,
    return
  }
  func.func @transform_0(%arg0: i32) -> (i32, i32) {
    %c0_i32 = arith.constant 0 : i32
    %c0_i32_0 = arith.constant 0 : i32
    return %arg0, %c0_i32 : i32, i32
  }
  func.func @transform_1(%arg0: i32) -> (i32, i32) {
    %c0_i32 = arith.constant 0 : i32
    %c0_i32_0 = arith.constant 0 : i32
    return %arg0, %c0_i32 : i32, i32
  }
  func.func @transform_2(%arg0: i32) -> (i32, i32) {
    %c0_i32 = arith.constant 0 : i32
    %c0_i32_0 = arith.constant 0 : i32
    return %arg0, %c0_i32 : i32, i32
  }
}

</mosaic_0001>

<bundles_post_ra>
// kernel: series_decomposition.1
= control target key start
LH: loop header
LB: loop body
LE: loop exit
PB: predicated region body
PF: predicated region fallthrough
CT: control target
= control target key end

     0   :  { %s82_s11 = smov 2   ;;  %vm20_vm0 = vcmask 15360   ;;  %vm23_vm1 = vcmask 146432   ;;  %s83_s14 = smov 125   ;;  %vm62_vm2 = vcmask 130048   ;;  %s124_s0 = inlined_call_operand.vmem [shape: f32[16,16], index: 0, kind: input, shape index: {}]   ;;  %s125_s1 = inlined_call_operand.vmem [shape: f32[16,16], index: 1, kind: output, shape index: {0}]   ;;  %s126_s2 = inlined_call_operand.vmem [shape: f32[16,16], index: 2, kind: output, shape index: {1}]  }
   0x1   :  { %v10_v0 = vld [vmem:[%s124_s0] sm:$0xff]  ;;  %v11_v1 = vld [vmem:[%s124_s0 + $0x8] sm:$0xff]  ;;  %s84_s15 = smov 126   ;;  %s85_s16 = smov 127  }
   0x2   :  { %14 = vrot.lane.b32.xlu0 %v10_v0, %s82_s11  ;;  %s86_s17 = smov 124  }
   0xa   :  { %16 = vrot.lane.b32.xlu0 %v11_v1, %s82_s11 }
  0x74   :  { %v15_v2 = vpop.permute.xlu0 %14 }
  0x75   :  { %v21_v3 = vsel %vm20_vm0, 0.0, %v15_v2 }
  0x76   :  { %v24_v4 = vsel %vm23_vm1, %v21_v3, 0.0 }
  0x77   :  { %44 = vrot.lane.b32.xlu0 %v24_v4, %s83_s14  ;;  %36 = vrot.lane.b32.xlu2 %v24_v4, %s84_s15 }
  0x78   :  { %28 = vrot.lane.b32.xlu1 %v24_v4, %s85_s16 }
  0x7c   :  { %v17_v5 = vpop.permute.xlu0 %16 }
  0x7d   :  { %v22_v6 = vsel %vm20_vm0, 0.0, %v17_v5 }
  0x7e   :  { %v25_v7 = vsel %vm23_vm1, %v22_v6, 0.0 }
  0x7f   :  { %54 = vrot.lane.b32.xlu0 %v25_v7, %s86_s17  ;;  %38 = vrot.lane.b32.xlu2 %v25_v7, %s84_s15 }
  0x80   :  { %30 = vrot.lane.b32.xlu1 %v25_v7, %s85_s16 }
  0x87   :  { %52 = vrot.lane.b32.xlu2 %v24_v4, %s86_s17 }
  0x88   :  { %46 = vrot.lane.b32.xlu1 %v25_v7, %s83_s14 }
  0xd1   :  { %v37_v8 = vpop.permute.xlu2 %36 }
  0xd9   :  { %v39_v9 = vpop.permute.xlu2 %38 }
  0xe1   :  { %v53_v15 = vpop.permute.xlu2 %52 }
  0xe9   :  { %v45_v13 = vpop.permute.xlu0 %44 }
  0xea   :  { %v29_v10 = vpop.permute.xlu1 %28 }
  0xeb   :  { %v34_v11 = vadd.f32 %v29_v10, %v24_v4 }
  0xed   :  { %v42_v12 = vadd.f32 %v37_v8, %v34_v11 }
  0xef   :  { %v50_v14 = vadd.f32 %v45_v13, %v42_v12 }
  0xf1   :  { %v58_v16 = vadd.f32 %v53_v15, %v50_v14  ;;  %v55_v24 = vpop.permute.xlu0 %54 }
  0xf2   :  { %v31_v17 = vpop.permute.xlu1 %30 }
  0xf3   :  { %v60_v18 = vmul.f32 0.2, %v58_v16  ;;  %v35_v20 = vadd.f32 %v31_v17, %v25_v7 }
  0xf5   :  { %63 = vst.msk [vmem:[%s125_s1] sm:$0xff] %vm62_vm2, %v60_v18  ;;  %v65_v19 = vsub.f32 %v10_v0, %v60_v18  ;;  %v43_v21 = vadd.f32 %v39_v9, %v35_v20 }
  0xf7   :  { %67 = vst.msk [vmem:[%s126_s2] sm:$0xff] %vm62_vm2, %v65_v19 }
  0xfa   :  { %v47_v22 = vpop.permute.xlu1 %46 }
  0xfb   :  { %v51_v23 = vadd.f32 %v47_v22, %v43_v21 }
  0xfd   :  { %v59_v25 = vadd.f32 %v55_v24, %v51_v23 }
  0xff   :  { %v61_v26 = vmul.f32 0.2, %v59_v25 }
 0x101   :  { %64 = vst.msk [vmem:[%s125_s1 + $0x8] sm:$0xff] %vm62_vm2, %v61_v26  ;;  %v66_v27 = vsub.f32 %v11_v1, %v61_v26 }
 0x103   :  { %68 = vst.msk [vmem:[%s126_s2 + $0x8] sm:$0xff] %vm62_vm2, %v66_v27 }

</bundles_post_ra>
